<compile_context>
chip_gen: v7x
topology: tpu7x:2x2x1
jax: 0.10.0
libtpu: 0.0.40
codegen_flags: <defaults>
</compile_context>

<pallas_src>
import functools

import jax
import jax.numpy as jnp
from jax.experimental import pallas as pl
from jax.experimental.pallas import tpu as pltpu


def _round_up(v, m):
    return ((v + m - 1) // m) * m


def _discriminator_xx_kernel(xx_ref, w1_ref, b1_ref, w2_ref, b2_ref,
                             logits_ref, mid_ref, *, negative_slope):
    """Fused: (pre-concatenated) Linear -> LeakyReLU -> (Dropout=id) -> Linear."""
    # fc_1 : single K = 2*in_features MXU matmul, f32 accumulation.
    h = (jnp.dot(xx_ref[...], w1_ref[...], preferred_element_type=jnp.float32)
         + b1_ref[...])

    # LeakyReLU(negative_slope); Dropout is inference-mode identity.
    mid = jnp.where(h >= 0, h, negative_slope * h)
    mid_ref[...] = mid.astype(mid_ref.dtype)

    # fc_2 : lane-dense (N padded to a multiple of 128 by the wrapper).
    logits = (jnp.dot(mid, w2_ref[...], preferred_element_type=jnp.float32)
              + b2_ref[...])
    logits_ref[...] = logits.astype(logits_ref.dtype)


def _choose_tile_b(batch, k_in, n_mid_pad, n_cls_pad,
                   vmem_budget_bytes=24 * 1024 * 1024):
    """Largest batch tile that fits a VMEM budget safe on v5e/v6e/v7x."""
    # Weights/biases are resident (BlockSpec still allocates 2 buffers each).
    weight_bytes = 2 * 4 * (k_in * n_mid_pad + n_mid_pad
                            + n_mid_pad * n_cls_pad + n_cls_pad)
    # Activation streams are double-buffered (input + two outputs), f32.
    bytes_per_row = 2 * 4 * (k_in + n_mid_pad + n_cls_pad)
    avail = max(vmem_budget_bytes - weight_bytes, bytes_per_row * 8)
    tile = avail // bytes_per_row
    tile = int(min(tile, 512, _round_up(batch, 8)))
    tile = max(8, (tile // 8) * 8)
    return tile


def discriminator_xx_forward(x, rec_x, params, *, negative_slope=0.2):
    """Runs the fused DiscriminatorXX forward pass as one Pallas call.

    x, rec_x : (B, in_features) float32
    params   : dict with
       w1 (2*in_features, out_features)  -- torch fc_1 weight, pre-transposed
       b1 (1, out_features)
       w2 (out_features, n_classes)      -- torch fc_2 weight, pre-transposed
       b2 (1, n_classes)
    returns  : (logits (B, n_classes), mid_layer (B, out_features))
    """
    B, in_features = x.shape
    k_in = 2 * in_features
    out_features = params["w1"].shape[1]
    n_classes = params["w2"].shape[1]

    # ---- lane-dense padding of the feature / class axes (zeros are exact) ----
    out_pad = _round_up(out_features, 128)
    cls_pad = _round_up(n_classes, 128)

    w1 = jnp.zeros((k_in, out_pad), jnp.float32).at[:, :out_features].set(params["w1"])
    b1 = jnp.zeros((1, out_pad), jnp.float32).at[:, :out_features].set(params["b1"])
    w2 = jnp.zeros((out_pad, cls_pad), jnp.float32).at[:out_features, :n_classes].set(params["w2"])
    b2 = jnp.zeros((1, cls_pad), jnp.float32).at[:, :n_classes].set(params["b2"])

    # ---- batch tiling (generation-aware VMEM budget) ----
    tile_b = _choose_tile_b(B, k_in, out_pad, cls_pad)
    b_pad = _round_up(B, tile_b)
    grid = (b_pad // tile_b,)

    # Fuse the concat once in the wrapper -> single K=2*in_features matmul.
    xx = jnp.concatenate([x, rec_x], axis=1)
    if b_pad != B:
        xx = jnp.zeros((b_pad, k_in), xx.dtype).at[:B].set(xx)

    kernel = functools.partial(_discriminator_xx_kernel,
                               negative_slope=negative_slope)

    def pinned(shape):
        return pl.BlockSpec(shape, lambda i: (0, 0))

    logits_p, mid_p = pl.pallas_call(
        kernel,
        out_shape=(
            jax.ShapeDtypeStruct((b_pad, cls_pad), jnp.float32),
            jax.ShapeDtypeStruct((b_pad, out_pad), jnp.float32),
        ),
        grid=grid,
        in_specs=[
            pl.BlockSpec((tile_b, k_in), lambda i: (i, 0)),   # xx (streamed)
            pinned(w1.shape),                                 # weights pinned
            pinned(b1.shape),
            pinned(w2.shape),
            pinned(b2.shape),
        ],
        out_specs=(
            pl.BlockSpec((tile_b, cls_pad), lambda i: (i, 0)),
            pl.BlockSpec((tile_b, out_pad), lambda i: (i, 0)),
        ),
        compiler_params=pltpu.CompilerParams(
            dimension_semantics=("parallel",),     # use both TCs on v7x
            vmem_limit_bytes=48 * 1024 * 1024,     # safe on v7x 64 MiB VMEM
        ),
    )(xx, w1, b1, w2, b2)

    # Strip padding outside the kernel.
    logits = logits_p[:B, :n_classes]
    mid = mid_p[:B, :out_features]
    return logits, mid


def init_params(key, in_features, out_features, n_classes):
    """Deterministic synthetic init (PyTorch-Linear-like uniform ranges)."""
    k1, k2, k3, k4 = jax.random.split(key, 4)
    lim1 = 1.0 / jnp.sqrt(jnp.float32(2 * in_features))
    lim2 = 1.0 / jnp.sqrt(jnp.float32(out_features))
    # fc_1 weight is (out_features, 2*in_features) in torch; stored transposed.
    w1 = jax.random.uniform(k1, (2 * in_features, out_features),
                            jnp.float32, -lim1, lim1)
    b1 = jax.random.uniform(k2, (1, out_features), jnp.float32, -lim1, lim1)
    w2 = jax.random.uniform(k3, (out_features, n_classes),
                            jnp.float32, -lim2, lim2)
    b2 = jax.random.uniform(k4, (1, n_classes), jnp.float32, -lim2, lim2)
    return {"w1": w1, "b1": b1, "w2": w2, "b2": b2}


def reference_forward(x, rec_x, params, negative_slope):
    xx = jnp.concatenate([x, rec_x], axis=1)
    h = xx @ params["w1"] + params["b1"]
    mid = jnp.where(h >= 0, h, negative_slope * h)
    logits = mid @ params["w2"] + params["b2"]
    return logits, mid


if __name__ == "__main__":
    B, in_features, out_features, n_classes = 8, 16, 32, 1
    negative_slope = 0.2

    key = jax.random.PRNGKey(0)
    kx, kr, kp = jax.random.split(key, 3)
    x = jax.random.normal(kx, (B, in_features), jnp.float32)
    rec_x = jax.random.normal(kr, (B, in_features), jnp.float32)
    params = init_params(kp, in_features, out_features, n_classes)

    logits, mid = discriminator_xx_forward(x, rec_x, params,
                                           negative_slope=negative_slope)
    jax.block_until_ready((logits, mid))

    ref_logits, ref_mid = reference_forward(x, rec_x, params, negative_slope)
    assert logits.shape == (B, n_classes) and mid.shape == (B, out_features)
    assert jnp.allclose(logits, ref_logits, atol=1e-5, rtol=1e-5)
    assert jnp.allclose(mid, ref_mid, atol=1e-5, rtol=1e-5)

    print("KERNEL_OK")
</pallas_src>

<mosaic_0001>
module attributes {stable_mosaic.version = 11 : i64} {
  func.func @_discriminator_xx_kernel(%arg0: i32, %arg1: memref<8x32xf32, #tpu.memory_space<vmem>>, %arg2: memref<32x128xf32, #tpu.memory_space<vmem>>, %arg3: memref<1x128xf32, #tpu.memory_space<vmem>>, %arg4: memref<128x128xf32, #tpu.memory_space<vmem>>, %arg5: memref<1x128xf32, #tpu.memory_space<vmem>>, %arg6: memref<8x128xf32, #tpu.memory_space<vmem>>, %arg7: memref<8x128xf32, #tpu.memory_space<vmem>>) attributes {dimension_semantics = [#tpu.dimension_semantics<parallel>], iteration_bounds = array<i64: 1>, scalar_prefetch = 0 : i64, scratch_operands = 0 : i64, tpu.core_type = #tpu.core_type<tc>, window_params = [{transform_indices = @transform_0, window_bounds = array<i64: 8, 32>}, {pipeline_mode = #tpu.pipeline_mode<synchronous>, transform_indices = @transform_1, window_bounds = array<i64: 32, 128>}, {pipeline_mode = #tpu.pipeline_mode<synchronous>, transform_indices = @transform_2, window_bounds = array<i64: 1, 128>}, {pipeline_mode = #tpu.pipeline_mode<synchronous>, transform_indices = @transform_3, window_bounds = array<i64: 128, 128>}, {pipeline_mode = #tpu.pipeline_mode<synchronous>, transform_indices = @transform_4, window_bounds = array<i64: 1, 128>}, {transform_indices = @transform_5, window_bounds = array<i64: 8, 128>}, {transform_indices = @transform_6, window_bounds = array<i64: 8, 128>}]} {
    %c0 = arith.constant 0 : index
    %c0_0 = arith.constant 0 : index
    %0 = vector.load %arg1[%c0, %c0_0] : memref<8x32xf32, #tpu.memory_space<vmem>>, vector<8x32xf32>
    %c0_1 = arith.constant 0 : index
    %c0_2 = arith.constant 0 : index
    %1 = vector.load %arg2[%c0_1, %c0_2] : memref<32x128xf32, #tpu.memory_space<vmem>>, vector<32x128xf32>
    %cst = arith.constant dense<0.000000e+00> : vector<8x128xf32>
    %2 = tpu.matmul %0, %1, %cst {dimension_numbers = #tpu.dot_dimension_numbers<[1], [0], [0], [1], [0, 0, 1, 1], [], []>} : vector<8x32xf32>, vector<32x128xf32>, vector<8x128xf32> -> vector<8x128xf32>
    %c0_3 = arith.constant 0 : index
    %c0_4 = arith.constant 0 : index
    %3 = vector.load %arg3[%c0_3, %c0_4] : memref<1x128xf32, #tpu.memory_space<vmem>>, vector<1x128xf32>
    %4 = vector.broadcast %3 : vector<1x128xf32> to vector<8x128xf32>
    %5 = arith.addf %2, %4 : vector<8x128xf32>
    %cst_5 = arith.constant 0.000000e+00 : f32
    %6 = vector.broadcast %cst_5 : f32 to vector<8x128xf32>
    %7 = arith.cmpf oge, %5, %6 : vector<8x128xf32>
    %cst_6 = arith.constant 2.000000e-01 : f32
    %8 = vector.broadcast %cst_6 : f32 to vector<8x128xf32>
    %9 = arith.mulf %8, %5 : vector<8x128xf32>
    %10 = arith.select %7, %5, %9 : vector<8x128xi1>, vector<8x128xf32>
    %c0_7 = arith.constant 0 : index
    %c0_8 = arith.constant 0 : index
    %11 = vector.load %arg7[%c0_7, %c0_8] : memref<8x128xf32, #tpu.memory_space<vmem>>, vector<8x128xf32>
    tpu.vector_store %arg7[%c0_7, %c0_8], %10 {strides = array<i32>} : memref<8x128xf32, #tpu.memory_space<vmem>>, vector<8x128xf32>,
    %c0_9 = arith.constant 0 : index
    %c0_10 = arith.constant 0 : index
    %12 = vector.load %arg4[%c0_9, %c0_10] : memref<128x128xf32, #tpu.memory_space<vmem>>, vector<128x128xf32>
    %cst_11 = arith.constant dense<0.000000e+00> : vector<8x128xf32>
    %13 = tpu.matmul %10, %12, %cst_11 {dimension_numbers = #tpu.dot_dimension_numbers<[1], [0], [0], [1], [0, 0, 1, 1], [], []>} : vector<8x128xf32>, vector<128x128xf32>, vector<8x128xf32> -> vector<8x128xf32>
    %c0_12 = arith.constant 0 : index
    %c0_13 = arith.constant 0 : index
    %14 = vector.load %arg5[%c0_12, %c0_13] : memref<1x128xf32, #tpu.memory_space<vmem>>, vector<1x128xf32>
    %15 = vector.broadcast %14 : vector<1x128xf32> to vector<8x128xf32>
    %16 = arith.addf %13, %15 : vector<8x128xf32>
    %c0_14 = arith.constant 0 : index
    %c0_15 = arith.constant 0 : index
    %17 = vector.load %arg6[%c0_14, %c0_15] : memref<8x128xf32, #tpu.memory_space<vmem>>, vector<8x128xf32>
    tpu.vector_store %arg6[%c0_14, %c0_15], %16 {strides = array<i32>} : memref<8x128xf32, #tpu.memory_space<vmem>>, vector<8x128xf32>,
    return
  }
  func.func @transform_0(%arg0: i32) -> (i32, i32) {
    %c0_i32 = arith.constant 0 : i32
    %c0_i32_0 = arith.constant 0 : i32
    return %arg0, %c0_i32 : i32, i32
  }
  func.func @transform_1(%arg0: i32) -> (i32, i32) {
    %c0_i32 = arith.constant 0 : i32
    %c0_i32_0 = arith.constant 0 : i32
    %c0_i32_1 = arith.constant 0 : i32
    return %c0_i32, %c0_i32_0 : i32, i32
  }
  func.func @transform_2(%arg0: i32) -> (i32, i32) {
    %c0_i32 = arith.constant 0 : i32
    %c0_i32_0 = arith.constant 0 : i32
    %c0_i32_1 = arith.constant 0 : i32
    return %c0_i32, %c0_i32_0 : i32, i32
  }
  func.func @transform_3(%arg0: i32) -> (i32, i32) {
    %c0_i32 = arith.constant 0 : i32
    %c0_i32_0 = arith.constant 0 : i32
    %c0_i32_1 = arith.constant 0 : i32
    return %c0_i32, %c0_i32_0 : i32, i32
  }
  func.func @transform_4(%arg0: i32) -> (i32, i32) {
    %c0_i32 = arith.constant 0 : i32
    %c0_i32_0 = arith.constant 0 : i32
    %c0_i32_1 = arith.constant 0 : i32
    return %c0_i32, %c0_i32_0 : i32, i32
  }
  func.func @transform_5(%arg0: i32) -> (i32, i32) {
    %c0_i32 = arith.constant 0 : i32
    %c0_i32_0 = arith.constant 0 : i32
    return %arg0, %c0_i32 : i32, i32
  }
  func.func @transform_6(%arg0: i32) -> (i32, i32) {
    %c0_i32 = arith.constant 0 : i32
    %c0_i32_0 = arith.constant 0 : i32
    return %arg0, %c0_i32 : i32, i32
  }
}

</mosaic_0001>

<bundles_post_ra>
// kernel: tpu_custom_call.1
= control target key start
LH: loop header
LB: loop body
LE: loop exit
PB: predicated region body
PF: predicated region fallthrough
CT: control target
= control target key end

     0   :  { %12 = vsyncpa [#allocation3], 0  ;;  %s623_s0 = inlined_call_operand.hbm [shape: f32[8,32], index: 0, kind: input, shape index: {}]   ;;  %s624_s1 = inlined_call_operand.hbm [shape: f32[32,128], index: 1, kind: input, shape index: {}]   ;;  %s625_s2 = inlined_call_operand.vmem [shape: f32[1,128], index: 2, kind: input, shape index: {}]   ;;  %s626_s3 = inlined_call_operand.hbm [shape: f32[128,128], index: 3, kind: input, shape index: {}]   ;;  %s627_s4 = inlined_call_operand.vmem [shape: f32[1,128], index: 4, kind: input, shape index: {}]   ;;  %s628_s5 = inlined_call_operand.hbm [shape: f32[8,128], index: 5, kind: output, shape index: {0}]   ;;  %s629_s6 = inlined_call_operand.hbm [shape: f32[8,128], index: 6, kind: output, shape index: {1}]  }
   0x1   :  { %13 = vsyncpa [#allocation6], 0 }
   0x2   :  { %14 = vsyncpa [#allocation4], 0 }
   0x3   :  { %15 = vsyncpa [#allocation10], 0  ;;  %s506_s21 = smov [#allocation5]   ;;  %s388_s25 = scalar_lea.hbm %s624_s1, 512 }
   0x4   :  { %s31_s22 = sshll.u32 %s506_s21, 4  ;;  %p389_p0 = scmp.ne.s32.totalorder %s624_s1, %s388_s25  ;;  %s32_s22 = int_to_ptr.vmem [resolvable:$true] %s31_s22 }
   0x5   :  { %p392_p1 = scmp.lt.u32.totalorder %s388_s25, %s624_s1 }
   0x7   :  { %p394_p2 = pnand %p392_p1, %p389_p0 }
   0x9   :  { %397 = shalt.err (!%p394_p2)
}
   0xa   :  { %s398_s30 = scalar_lea.vmem %s32_s22, 512  ;;  %p403_p4 = scmp.lt.s32.totalorder %s32_s22, %s32_s22 }
   0xb   :  { %p399_p3 = scmp.ne.s32.totalorder %s32_s22, %s398_s30  ;;  %p404_p5 = scmp.lt.s32.totalorder %s398_s30, %s398_s30 }
   0xd   :  { %p405_p6 = por %p404_p5, %p403_p4 }
   0xf   :  { %p406_p7 = pnand %p405_p6, %p399_p3 }
  0x11   :  { %409 = shalt.err (!%p406_p7)
}
  0x12   :  { %s507_s7 = smov 128   ;;  %s508_s8 = smov 8  }
  0x13   :  { %37 = dma.hbm_to_vmem [thread:$0]  %s624_s1, 512, %s32_s22, [#allocation6], %s507_s7, %s507_s7, %s508_s8  }
  0x14   :  { %s509_s11 = smov [#allocation2]   ;;  %s510_s13 = smov [#allocation7]  }
  0x15   :  { %s22_s12 = sshll.u32 %s509_s11, 4  ;;  %s45_s14 = sshll.u32 %s510_s13, 4  ;;  %s23_s12 = int_to_ptr.vmem [resolvable:$true] %s22_s12  ;;  %s46_s14 = int_to_ptr.vmem [resolvable:$true] %s45_s14 }
  0x16   :  { %s410_s17 = scalar_lea.hbm %s623_s0, 128 }
  0x17   :  { %p411_p8 = scmp.ne.s32.totalorder %s623_s0, %s410_s17  ;;  %p414_p9 = scmp.lt.u32.totalorder %s410_s17, %s623_s0 }
  0x19   :  { %p416_p10 = pnand %p414_p9, %p411_p8 }
  0x1b   :  { %419 = shalt.err (!%p416_p10)
}
  0x1c   :  { %s420_s1 = scalar_lea.vmem %s23_s12, 128  ;;  %p425_p12 = scmp.lt.s32.totalorder %s23_s12, %s23_s12 }
  0x1d   :  { %p421_p11 = scmp.ne.s32.totalorder %s23_s12, %s420_s1  ;;  %p426_p13 = scmp.lt.s32.totalorder %s420_s1, %s420_s1 }
  0x1f   :  { %p427_p0 = por %p426_p13, %p425_p12 }
  0x21   :  { %p428_p1 = pnand %p427_p0, %p421_p11 }
  0x23   :  { %431 = shalt.err (!%p428_p1)
}
  0x24   :  { %25 = dma.hbm_to_vmem [thread:$0]  %s623_s0, 128, %s23_s12, [#allocation3]  }
  0x25   :  { %s432_s26 = scalar_lea.hbm %s626_s3, 2048 }
  0x26   :  { %p433_p2 = scmp.ne.s32.totalorder %s626_s3, %s432_s26  ;;  %p436_p3 = scmp.lt.u32.totalorder %s432_s26, %s626_s3 }
  0x28   :  { %p438_p4 = pnand %p436_p3, %p433_p2 }
  0x2a   :  { %441 = shalt.err (!%p438_p4)
}
  0x2b   :  { %s442_s9 = scalar_lea.vmem %s46_s14, 2048  ;;  %p447_p6 = scmp.lt.s32.totalorder %s46_s14, %s46_s14 }
  0x2c   :  { %p443_p5 = scmp.ne.s32.totalorder %s46_s14, %s442_s9  ;;  %p448_p7 = scmp.lt.s32.totalorder %s442_s9, %s442_s9 }
  0x2e   :  { %p449_p8 = por %p448_p7, %p447_p6 }
  0x30   :  { %p450_p9 = pnand %p449_p8, %p443_p5 }
  0x32   :  { %453 = shalt.err (!%p450_p9)
}
  0x33   :  { %51 = dma.hbm_to_vmem [thread:$0]  %s626_s3, 2048, %s46_s14, [#allocation6], %s507_s7, %s507_s7, %s508_s8  }
  0x34   :  { %498 = dma.done.wait [#allocation3], 128  }
  0x35   :  { %499 = vsyncadd [#allocation3], 4294967168 }
  0x36   :  { %500 = dma.done.wait [#allocation6], 2560  }
  0x37   :  { %501 = vsyncadd [#allocation6], 4294964736  ;;  %v511_v0 = vmov 0.0|0.0   ;;  %vm512_vm0 = vmmov 0   ;;  %v513_v1 = vmov 0.0   ;;  %v64_v2 = vld [vmem:[#allocation5] sm:$0xff] }
  0x38   :  { %348 = vmatprep.subr.bf16.mxu0 %v511_v0  ;;  %310 = vmatprep.mubr.msk.f32.mxu0 %vm512_vm0, %v513_v1  ;;  %v65_v3 = vld [vmem:[#allocation5 + $0x8] sm:$0xff]  ;;  %v66_v4 = vld [vmem:[#allocation5 + $0x10] sm:$0xff]  ;;  %v67_v6 = vld [vmem:[#allocation5 + $0x18] sm:$0xff]  ;;  %vm75_vm1 = vcmask 261120   ;;  %s514_s8 = smov [#allocation9]  }
  0x39   :  { %354 = vmatprep.subr.bf16.mxu1 %v511_v0  ;;  %345 = vmatprep.mubr.msk.f32.mxu1 %vm512_vm0, %v513_v1  ;;  %v349_v5 = vpack.c.bf16 %v65_v3, %v64_v2  ;;  %v153_v7 = vld [vmem:[#allocation7] sm:$0xff]  ;;  %v154_v8 = vld [vmem:[#allocation7 + $0x8] sm:$0xff]  ;;  %v155_v9 = vld [vmem:[#allocation7 + $0x10] sm:$0xff]  ;;  %v352_v11 = vpack.c.bf16 %v67_v6, %v66_v4  ;;  %s263_s11 = sshll.u32 %s514_s8, 4  ;;  %s264_s11 = int_to_ptr.vmem [resolvable:$true] %s263_s11 }
  0x3a   :  { %v156_v10 = vld [vmem:[#allocation7 + $0x18] sm:$0xff]  ;;  %v355_v12 = vpack.c.bf16 %v154_v8, %v153_v7  ;;  %v157_v14 = vld [vmem:[#allocation7 + $0x20] sm:$0xff]  ;;  %v158_v15 = vld [vmem:[#allocation7 + $0x28] sm:$0xff]  ;;  %s454_s12 = scalar_lea.vmem %s264_s11, 128  ;;  %p459_p11 = scmp.lt.s32.totalorder %s264_s11, %s264_s11 }
  0x3b   :  { %350 = vmatpush3.bf16.msra.mxu0 %v349_v5  ;;  %v358_v13 = vpack.c.bf16 %v156_v10, %v155_v9  ;;  %v63_v16 = vld [vmem:[#allocation2] sm:$0xff]  ;;  %v361_v17 = vpack.c.bf16 %v158_v15, %v157_v14  ;;  %v159_v18 = vld [vmem:[#allocation7 + $0x30] sm:$0xff]  ;;  %v161_v21 = vld [vmem:[#allocation7 + $0x40] sm:$0xff]  ;;  %p455_p10 = scmp.ne.s32.totalorder %s264_s11, %s454_s12  ;;  %p460_p12 = scmp.lt.s32.totalorder %s454_s12, %s454_s12 }
  0x3c   :  { %351 = vmatprep.subr.bf16.mxu0 %v511_v0  ;;  %356 = vmatpush3.bf16.msra.mxu1 %v355_v12  ;;  %v160_v19 = vld [vmem:[#allocation7 + $0x38] sm:$0xff]  ;;  %v162_v22 = vld [vmem:[#allocation7 + $0x48] sm:$0xff]  ;;  %v163_v24 = vld [vmem:[#allocation7 + $0x50] sm:$0xff] }
  0x3d   :  { %357 = vmatprep.subr.bf16.mxu1 %v511_v0  ;;  %v364_v20 = vpack.c.bf16 %v160_v19, %v159_v18  ;;  %v367_v23 = vpack.c.bf16 %v162_v22, %v161_v21  ;;  %v164_v25 = vld [vmem:[#allocation7 + $0x58] sm:$0xff]  ;;  %v165_v27 = vld [vmem:[#allocation7 + $0x60] sm:$0xff]  ;;  %v166_v28 = vld [vmem:[#allocation7 + $0x68] sm:$0xff]  ;;  %p461_p13 = por %p460_p12, %p459_p11 }
  0x3e   :  { %v370_v26 = vpack.c.bf16 %v164_v25, %v163_v24  ;;  %v373_v29 = vpack.c.bf16 %v166_v28, %v165_v27  ;;  %v167_v30 = vld [vmem:[#allocation7 + $0x70] sm:$0xff]  ;;  %v168_v31 = vld [vmem:[#allocation7 + $0x78] sm:$0xff] }
  0x3f   :  { %353 = vmatpush3.bf16.msra.mxu0 %v352_v11  ;;  %v376_v32 = vpack.c.bf16 %v168_v31, %v167_v30  ;;  %v277_v33 = vld [vmem:[%s625_s2] ss:$0 sm:$0xff]  ;;  %p462_p0 = pnand %p461_p13, %p455_p10 }
  0x40   :  { %359 = vmatpush3.bf16.msra.mxu1 %v358_v13 }
  0x41   :  { %360 = vmatprep.subr.bf16.mxu1 %v511_v0 }
  0x42   :  { %311 = vmatmul.mubr.msk.f32.vlgmr.msra.gmra.mrb[0].mxu0 %vm75_vm1, %v63_v16 }
  0x44   :  { %362 = vmatpush3.bf16.msra.mxu1 %v361_v17 }
  0x45   :  { %363 = vmatprep.subr.bf16.mxu1 %v511_v0 }
  0x48   :  { %365 = vmatpush3.bf16.msra.mxu1 %v364_v20 }
  0x49   :  { %366 = vmatprep.subr.bf16.mxu1 %v511_v0 }
  0x4c   :  { %368 = vmatpush3.bf16.msra.mxu1 %v367_v23 }
  0x4d   :  { %369 = vmatprep.subr.bf16.mxu1 %v511_v0 }
  0x50   :  { %371 = vmatpush3.bf16.msra.mxu1 %v370_v26 }
  0x51   :  { %372 = vmatprep.subr.bf16.mxu1 %v511_v0 }
  0x54   :  { %374 = vmatpush3.bf16.msra.mxu1 %v373_v29 }
  0x55   :  { %375 = vmatprep.subr.bf16.mxu1 %v511_v0 }
  0x58   :  { %377 = vmatpush3.bf16.msra.mxu1 %v376_v32 }
 0x115   :  { %v145_v34 = vpop.f32.mrb[0].mxu0 }
 0x116   :  { %v146_v35 = vadd.f32 %v277_v33, %v145_v34  ;;  %v312_v36 = vpop.f32.mrb[1].mxu0 }
 0x118   :  { %v150_v37 = vmul.f32 0.2, %v146_v35  ;;  %vm149_vm2 = vcmp.ge.f32.partialorder %v146_v35, 0.0 }
 0x11a   :  { %v151_v38 = vsel %vm149_vm2, %v146_v35, %v150_v37 }
 0x11b   :  { %346 = vmatmul.mubr.f32.vlgmr.msra.gmra.mrb[0].mxu1 %v151_v38  ;;  %152 = vst [vmem:[#allocation9] sm:$0xff] %v151_v38 }
 0x11c   :  { %465 = shalt.err (!%p462_p0)
}
 0x11d   :  { %s466_s14 = scalar_lea.hbm %s629_s6, 128 }
 0x11e   :  { %p467_p1 = scmp.ne.s32.totalorder %s629_s6, %s466_s14  ;;  %p470_p2 = scmp.lt.u32.totalorder %s466_s14, %s629_s6 }
 0x120   :  { %p472_p3 = pnand %p470_p2, %p467_p1 }
 0x122   :  { %475 = shalt.err (!%p472_p3)
}
 0x123   :  { %266 = dma.vmem_to_hbm [thread:$0]  %s264_s11, 128, %s629_s6, [#allocation10]   ;;  %v279_v39 = vld [vmem:[%s627_s4] ss:$0 sm:$0xff] }
 0x124   :  { %s515_s22 = smov [#allocation8]  }
 0x125   :  { %s253_s23 = sshll.u32 %s515_s22, 4  ;;  %s254_s23 = int_to_ptr.vmem [resolvable:$true] %s253_s23 }
 0x126   :  { %s476_s24 = scalar_lea.vmem %s254_s23, 128  ;;  %p481_p5 = scmp.lt.s32.totalorder %s254_s23, %s254_s23 }
 0x127   :  { %p477_p4 = scmp.ne.s32.totalorder %s254_s23, %s476_s24  ;;  %p482_p6 = scmp.lt.s32.totalorder %s476_s24, %s476_s24 }
 0x129   :  { %p483_p7 = por %p482_p6, %p481_p5 }
 0x12b   :  { %p484_p8 = pnand %p483_p7, %p477_p4 }
 0x1ee   :  { %v242_v40 = vpop.f32.mrb[0].mxu1 }
 0x1ef   :  { %v243_v41 = vadd.f32 %v279_v39, %v242_v40  ;;  %v347_v42 = vpop.f32.mrb[1].mxu1 }
 0x1f1   :  { %246 = vst [vmem:[#allocation8] sm:$0xff] %v243_v41 }
 0x1f2   :  { %487 = shalt.err (!%p484_p8)
}
 0x1f3   :  { %s488_s26 = scalar_lea.hbm %s628_s5, 128 }
 0x1f4   :  { %p489_p9 = scmp.ne.s32.totalorder %s628_s5, %s488_s26  ;;  %p492_p10 = scmp.lt.u32.totalorder %s488_s26, %s628_s5 }
 0x1f6   :  { %p494_p11 = pnand %p492_p10, %p489_p9 }
 0x1f8   :  { %497 = shalt.err (!%p494_p11)
}
 0x1f9   :  { %256 = dma.vmem_to_hbm [thread:$0]  %s254_s23, 128, %s628_s5, [#allocation4]  }
 0x1fa   :  { %502 = dma.done.wait [#allocation4], 128  }
 0x1fb   :  { %503 = vsyncadd [#allocation4], 4294967168 }
 0x1fc   :  { %504 = dma.done.wait [#allocation10], 128  }
 0x1fd   :  { %505 = vsyncadd [#allocation10], 4294967168 }
 0x1fe   :  { %273 = vsyncpa [#allocation3], 1 }
 0x1ff   :  { %274 = vsyncpa [#allocation6], 1 }
 0x200   :  { %275 = vsyncpa [#allocation4], 1 }
 0x201   :  { %276 = vsyncpa [#allocation10], 1 }

</bundles_post_ra>
